<compile_context>
chip_gen: v6e
topology: v6e:2x2x1
jax: 0.10.0
libtpu: 0.0.40
codegen_flags: <defaults>
</compile_context>

<pallas_src>
import functools

import jax
import jax.numpy as jnp
from jax.experimental import pallas as pl
from jax.experimental.pallas import tpu as pltpu


def _linear_bn_kernel(x_ref, w_ref, g_ref, beta_ref, o_ref, *,
                      apply_relu, eps, inv_n):
    """One output-feature tile of Linear(no bias) -> BatchNorm1d [-> ReLU].

    The full contraction (K) and the full batch (N) are inside the block, so
    this is a single long MXU matmul followed by an exact-batch BN epilogue.
    The Linear bias is intentionally omitted: it cancels exactly under the BN
    mean subtraction that immediately follows the matmul.
    """
    # In-kernel bf16 cast of the resident activations (no-op if already bf16).
    x = x_ref[...].astype(jnp.bfloat16)
    # bf16 operands on the MXU, f32 result.
    h = jnp.dot(x, w_ref[...], preferred_element_type=jnp.float32)

    # Two-pass batch statistics (biased variance, PyTorch training-mode BN).
    mu = jnp.sum(h, axis=0, keepdims=True) * inv_n
    d = h - mu
    var = jnp.sum(d * d, axis=0, keepdims=True) * inv_n

    # Fold BN affine: y = (h - mu) * (gamma * rsqrt(var+eps)) + beta.
    scale = g_ref[...].astype(jnp.float32) * jax.lax.rsqrt(var + eps)
    y = d * scale + beta_ref[...].astype(jnp.float32)
    if apply_relu:
        y = jnp.maximum(y, 0.0)
    o_ref[...] = y.astype(o_ref.dtype)


def _pick_tn(n, k_dim, f_out, out_bytes, budget_bytes=32 * 1024 * 1024):
    """Largest lane-aligned feature tile that fits the VMEM budget.

    Prefers an even number of feature tiles (>= 2) so the 'parallel' grid axis
    splits evenly across v7x's two TensorCores; on v5e/v6e (1 TC) this is
    harmless. Budget is sized conservatively for v7x's 64 MiB VMEM.
    """
    def fits(tn):
        x_b = 2 * n * k_dim * 4        # resident x (double-buffer worst case)
        w_b = 2 * k_dim * tn * 2       # bf16 full-K weight slab, double-buffered
        o_b = 2 * n * tn * out_bytes   # output tile, double-buffered
        acc_b = n * tn * 4             # f32 matmul result / BN temporaries
        misc = 8 * tn * 4              # gamma/beta (+ buffers)
        return x_b + w_b + o_b + acc_b + misc <= budget_bytes

    cands = sorted((t for t in range(128, f_out + 1, 128) if f_out % t == 0),
                   reverse=True)
    if not cands:
        return f_out  # small / unaligned f_out: single full-extent tile
    for tn in cands:                      # even tile count first (v7x 2-TC)
        if (f_out // tn) % 2 == 0 and fits(tn):
            return tn
    for tn in cands:                      # otherwise biggest that fits
        if fits(tn):
            return tn
    return cands[-1]                      # smallest aligned tile as last resort


def _linear_bn(x, w, gamma, beta, *, apply_relu, out_dtype, tn=None, eps=1e-5):
    """Fused Linear(no bias) -> BatchNorm1d(batch stats) [-> ReLU]."""
    n, k_dim = x.shape
    kw, f_out = w.shape
    assert kw == k_dim
    out_bytes = jnp.dtype(out_dtype).itemsize
    tn = tn if tn is not None else _pick_tn(n, k_dim, f_out, out_bytes)
    assert f_out % tn == 0
    grid = (f_out // tn,)

    kernel = functools.partial(_linear_bn_kernel, apply_relu=apply_relu,
                               eps=eps, inv_n=1.0 / n)

    return pl.pallas_call(
        kernel,
        out_shape=jax.ShapeDtypeStruct((n, f_out), out_dtype),
        grid_spec=pltpu.PrefetchScalarGridSpec(
            num_scalar_prefetch=0,
            grid=grid,
            in_specs=[
                # x: resident — constant block index => DMA'd once per call.
                pl.BlockSpec((n, k_dim), lambda i: (0, 0)),
                # w: full-K bf16 slab per feature tile.
                pl.BlockSpec((k_dim, tn), lambda i: (0, i)),
                pl.BlockSpec((1, tn), lambda i: (0, i)),
                pl.BlockSpec((1, tn), lambda i: (0, i)),
            ],
            out_specs=pl.BlockSpec((n, tn), lambda i: (0, i)),
        ),
        compiler_params=pltpu.CompilerParams(
            # Feature tiles are independent (BN stats are per-feature) ->
            # megacore split on v7x; no-op on v5e/v6e.
            dimension_semantics=("parallel",),
            vmem_limit_bytes=40 * 1024 * 1024,
        ),
    )(x, w, gamma, beta)


def projection_mlp(x, params):
    """SimSiam projection_MLP forward. x: (N, in_dim) f32 -> (N, out_dim) f32."""
    (w1, g1, beta1, w3, g3, beta3) = params
    # x stays f32 in HBM; the kernel casts to bf16 on the fly (hidden under MXU).
    h = _linear_bn(x, w1, g1, beta1, apply_relu=True, out_dtype=jnp.bfloat16)
    y = _linear_bn(h, w3, g3, beta3, apply_relu=False, out_dtype=jnp.float32)
    return y


def init_params(key, in_dim, hidden_dim, out_dim):
    """Torch-equivalent f32 parameters (biases included, for the reference)."""
    # BatchNorm1d(hidden_dim) is applied to the layer-3 fc output, so the
    # module only works when out_dim == hidden_dim (default 2048/2048 config).
    assert out_dim == hidden_dim, "layer3 BN has num_features=hidden_dim"
    k1, k2, k3, k4 = jax.random.split(key, 4)
    lim1 = 1.0 / jnp.sqrt(in_dim)
    lim3 = 1.0 / jnp.sqrt(hidden_dim)
    w1 = jax.random.uniform(k1, (in_dim, hidden_dim), jnp.float32, -lim1, lim1)
    b1 = jax.random.uniform(k2, (1, hidden_dim), jnp.float32, -lim1, lim1)
    w3 = jax.random.uniform(k3, (hidden_dim, out_dim), jnp.float32, -lim3, lim3)
    b3 = jax.random.uniform(k4, (1, out_dim), jnp.float32, -lim3, lim3)
    g1 = jnp.ones((1, hidden_dim), jnp.float32)
    beta1 = jnp.zeros((1, hidden_dim), jnp.float32)
    g3 = jnp.ones((1, out_dim), jnp.float32)
    beta3 = jnp.zeros((1, out_dim), jnp.float32)
    return (w1, b1, g1, beta1, w3, b3, g3, beta3)


def pack_kernel_params(full_params):
    """Kernel-side params: drop biases (cancel under BN), store weights bf16."""
    (w1, _b1, g1, beta1, w3, _b3, g3, beta3) = full_params
    return (w1.astype(jnp.bfloat16), g1, beta1,
            w3.astype(jnp.bfloat16), g3, beta3)


if __name__ == "__main__":
    # Small but lane-aligned shapes (feature dims multiples of 128 keep stores
    # unmasked and vregs full). Real SimSiam uses in_dim=2048, hidden/out=2048.
    N, in_dim, hidden_dim, out_dim = 16, 256, 512, 512

    key = jax.random.PRNGKey(0)
    kx, kp = jax.random.split(key)
    x = jax.random.normal(kx, (N, in_dim), jnp.float32)
    full_params = init_params(kp, in_dim, hidden_dim, out_dim)
    params = pack_kernel_params(full_params)

    out = projection_mlp(x, params)
    jax.block_until_ready(out)

    # Pure-JAX f32 reference of the ORIGINAL math (biases included).
    def ref(x, p):
        (w1, b1, g1, beta1, w3, b3, g3, beta3) = p
        eps = 1e-5
        h = x @ w1 + b1
        h = (h - h.mean(0, keepdims=True)) / jnp.sqrt(h.var(0, keepdims=True) + eps) * g1 + beta1
        h = jnp.maximum(h, 0.0)
        y = h @ w3 + b3
        y = (y - y.mean(0, keepdims=True)) / jnp.sqrt(y.var(0, keepdims=True) + eps) * g3 + beta3
        return y

    r = ref(x, full_params)
    assert out.shape == (N, out_dim)
    # bf16 MXU operands (x, h, weights) -> compare against the f32 reference
    # with a correspondingly loose tolerance.
    max_err = float(jnp.max(jnp.abs(out - r)))
    assert max_err < 1e-1, max_err

    print("KERNEL_OK")
</pallas_src>

<mosaic_0001>
module attributes {stable_mosaic.version = 11 : i64} {
  func.func @_linear_bn_kernel(%arg0: i32, %arg1: memref<16x256xf32, #tpu.memory_space<vmem>>, %arg2: memref<256x256xbf16, #tpu.memory_space<vmem>>, %arg3: memref<1x256xf32, #tpu.memory_space<vmem>>, %arg4: memref<1x256xf32, #tpu.memory_space<vmem>>, %arg5: memref<16x256xbf16, #tpu.memory_space<vmem>>) attributes {dimension_semantics = [#tpu.dimension_semantics<parallel>], iteration_bounds = array<i64: 2>, scalar_prefetch = 0 : i64, scratch_operands = 0 : i64, tpu.core_type = #tpu.core_type<tc>, window_params = [{pipeline_mode = #tpu.pipeline_mode<synchronous>, transform_indices = @transform_0, window_bounds = array<i64: 16, 256>}, {transform_indices = @transform_1, window_bounds = array<i64: 256, 256>}, {transform_indices = @transform_2, window_bounds = array<i64: 1, 256>}, {transform_indices = @transform_3, window_bounds = array<i64: 1, 256>}, {transform_indices = @transform_4, window_bounds = array<i64: 16, 256>}]} {
    %c0 = arith.constant 0 : index
    %c0_0 = arith.constant 0 : index
    %0 = vector.load %arg1[%c0, %c0_0] : memref<16x256xf32, #tpu.memory_space<vmem>>, vector<16x256xf32>
    %1 = arith.truncf %0 : vector<16x256xf32> to vector<16x256xbf16>
    %c0_1 = arith.constant 0 : index
    %c0_2 = arith.constant 0 : index
    %2 = vector.load %arg2[%c0_1, %c0_2] : memref<256x256xbf16, #tpu.memory_space<vmem>>, vector<256x256xbf16>
    %cst = arith.constant dense<0.000000e+00> : vector<16x256xf32>
    %3 = tpu.matmul %1, %2, %cst {dimension_numbers = #tpu.dot_dimension_numbers<[1], [0], [0], [1], [0, 0, 1, 1], [], []>} : vector<16x256xbf16>, vector<256x256xbf16>, vector<16x256xf32> -> vector<16x256xf32>
    %cst_3 = arith.constant dense<0.000000e+00> : vector<256xf32>
    %4 = vector.multi_reduction <add>, %3, %cst_3 [0] : vector<16x256xf32> to vector<256xf32>
    %5 = vector.shape_cast %4 : vector<256xf32> to vector<1x256xf32>
    %cst_4 = arith.constant 6.250000e-02 : f32
    %6 = vector.broadcast %cst_4 : f32 to vector<1x256xf32>
    %7 = arith.mulf %5, %6 : vector<1x256xf32>
    %8 = vector.broadcast %7 : vector<1x256xf32> to vector<16x256xf32>
    %9 = arith.subf %3, %8 : vector<16x256xf32>
    %10 = arith.mulf %9, %9 : vector<16x256xf32>
    %cst_5 = arith.constant dense<0.000000e+00> : vector<256xf32>
    %11 = vector.multi_reduction <add>, %10, %cst_5 [0] : vector<16x256xf32> to vector<256xf32>
    %12 = vector.shape_cast %11 : vector<256xf32> to vector<1x256xf32>
    %cst_6 = arith.constant 6.250000e-02 : f32
    %13 = vector.broadcast %cst_6 : f32 to vector<1x256xf32>
    %14 = arith.mulf %12, %13 : vector<1x256xf32>
    %c0_7 = arith.constant 0 : index
    %c0_8 = arith.constant 0 : index
    %15 = vector.load %arg3[%c0_7, %c0_8] : memref<1x256xf32, #tpu.memory_space<vmem>>, vector<1x256xf32>
    %cst_9 = arith.constant 9.99999974E-6 : f32
    %16 = vector.broadcast %cst_9 : f32 to vector<1x256xf32>
    %17 = arith.addf %14, %16 : vector<1x256xf32>
    %18 = math.rsqrt %17 : vector<1x256xf32>
    %19 = arith.mulf %15, %18 : vector<1x256xf32>
    %20 = vector.broadcast %19 : vector<1x256xf32> to vector<16x256xf32>
    %21 = arith.mulf %9, %20 : vector<16x256xf32>
    %c0_10 = arith.constant 0 : index
    %c0_11 = arith.constant 0 : index
    %22 = vector.load %arg4[%c0_10, %c0_11] : memref<1x256xf32, #tpu.memory_space<vmem>>, vector<1x256xf32>
    %23 = vector.broadcast %22 : vector<1x256xf32> to vector<16x256xf32>
    %24 = arith.addf %21, %23 : vector<16x256xf32>
    %cst_12 = arith.constant 0.000000e+00 : f32
    %25 = vector.broadcast %cst_12 : f32 to vector<16x256xf32>
    %26 = arith.maximumf %24, %25 : vector<16x256xf32>
    %27 = arith.truncf %26 : vector<16x256xf32> to vector<16x256xbf16>
    %c0_13 = arith.constant 0 : index
    %c0_14 = arith.constant 0 : index
    %28 = vector.load %arg5[%c0_13, %c0_14] : memref<16x256xbf16, #tpu.memory_space<vmem>>, vector<16x256xbf16>
    tpu.vector_store %arg5[%c0_13, %c0_14], %27 {strides = array<i32>} : memref<16x256xbf16, #tpu.memory_space<vmem>>, vector<16x256xbf16>,
    return
  }
  func.func @transform_0(%arg0: i32) -> (i32, i32) {
    %c0_i32 = arith.constant 0 : i32
    %c0_i32_0 = arith.constant 0 : i32
    %c0_i32_1 = arith.constant 0 : i32
    return %c0_i32, %c0_i32_0 : i32, i32
  }
  func.func @transform_1(%arg0: i32) -> (i32, i32) {
    %c0_i32 = arith.constant 0 : i32
    %c0_i32_0 = arith.constant 0 : i32
    return %c0_i32, %arg0 : i32, i32
  }
  func.func @transform_2(%arg0: i32) -> (i32, i32) {
    %c0_i32 = arith.constant 0 : i32
    %c0_i32_0 = arith.constant 0 : i32
    return %c0_i32, %arg0 : i32, i32
  }
  func.func @transform_3(%arg0: i32) -> (i32, i32) {
    %c0_i32 = arith.constant 0 : i32
    %c0_i32_0 = arith.constant 0 : i32
    return %c0_i32, %arg0 : i32, i32
  }
  func.func @transform_4(%arg0: i32) -> (i32, i32) {
    %c0_i32 = arith.constant 0 : i32
    %c0_i32_0 = arith.constant 0 : i32
    return %c0_i32, %arg0 : i32, i32
  }
}

</mosaic_0001>

<bundles_post_ra>
// kernel: tpu_custom_call.1
= control target key start
LH: loop header
LB: loop body
LE: loop exit
PB: predicated region body
PF: predicated region fallthrough
CT: control target
= control target key end

     0   :  { %9 = vsyncpa [#allocation3], 0  ;;  %s1407_s0 = inlined_call_operand.hbm [shape: f32[16,256], index: 0, kind: input, shape index: {}]   ;;  %s1408_s1 = inlined_call_operand.hbm [shape: bf16[256,512], index: 1, kind: input, shape index: {}]   ;;  %s1409_s2 = inlined_call_operand.hbm [shape: f32[1,512], index: 2, kind: input, shape index: {}]   ;;  %s1410_s3 = inlined_call_operand.vmem [shape: f32[1,512], index: 3, kind: input, shape index: {}]   ;;  %s1411_s4 = inlined_call_operand.hbm [shape: bf16[16,512], index: 4, kind: output, shape index: {}]  }
   0x1   :  { %10 = vsyncpa [#allocation6], 0 }
   0x2   :  { %12 = vsyncpa [#allocation6 + $0x1], 0 }
   0x3   :  { %13 = vsyncpa [#allocation4], 0 }
   0x4   :  { %15 = vsyncpa [#allocation4 + $0x1], 0  ;;  %s1141_s15 = smov 0   ;;  %s1143_s16 = smov 0  }
   0x5   :  { %s1145_s17 = smov 0   ;;  %s1147_s18 = smov 0  }
   0x6 LB: > { %s1162_s19 = sadd.s32 1, %s1102_s18   ;;  %s49_s20 = sadd.s32 1, %s1098_s17  ;;  %s1102_s18 = sphi %s1147_s18, %s1433_s18   ;;  %s1098_s17 = sphi %s1145_s17, %s1432_s17   ;;  %s1094_s16 = sphi %s1143_s16, %s1431_s16   ;;  %s1090_s15 = sphi %s1141_s15, %s1430_s15  }
   0x7   : > { %s46_s21 = ssub.s32 %s1102_s18, %s1162_s19  ;;  %p56_p0 = scmp.ne.s32.totalorder %s1098_s17, %s1094_s16 }
   0x8   : > { %p47_p1 = scmp.eq.s32.totalorder %s46_s21, 0  ;;  %p57_p2 = scmp.eq.s32.totalorder %s1102_s18, 0 }
   0x9   : > { %p856_p5 = scmp.lt.s32.totalorder %s1102_s18, 2  ;;  %s177_s23 = sand.u32 1, %s1102_s18  }
   0xa   : > { %s1172_s22 = scalar_select %p47_p1, %s1098_s17, %s49_s20  }
   0xb   : > { %p58_p4 = por %p57_p2, %p56_p0  ;;  %s179_s24 = sand.u32 1, %s1098_s17  }
   0xc   : > { %s774_s25 = sshll.u32 %s179_s24, 8  ;;  %s825_s26 = sshll.u32 %s1102_s18, 7 }
   0xd   : > { %s1186_s29 = scalar_lea.hbm %s1408_s1, %s825_s26  ;;  %s181_s30 = scalar_lea.vmem [#allocation5], %s774_s25 }
   0xe   : > { %s188_s5 = sshll.u32 %s181_s30, 4  ;;  %p1190_p6 = pnand %p856_p5, %p58_p4  ;;  %s1188_s5 = int_to_ptr.vmem [resolvable:$true] %s188_s5 }
   0xf   : > { %s1194_s7 = scalar_lea.sflag [#allocation6], %s177_s23  ;;  %s952_s8 = scalar_lea.hbm %s1186_s29, 4096 }
  0x10   : > { %p953_p7 = scmp.ne.s32.totalorder %s1186_s29, %s952_s8  ;;  %p1413_p8 = pneg %p1190_p6 }
  0x11   : > { %s957_s11 = scalar_lea.hbm %s1408_s1, 8192  ;;  %p958_p11 = scmp.lt.s32.totalorder %s1186_s29, %s1408_s1 }
  0x12   : > { %p955_p9 = pnand %p1413_p8, %p953_p7  ;;  %p959_p12 = scmp.lt.s32.totalorder %s957_s11, %s952_s8 }
  0x14   : > { %p956_p10 = pneg %p955_p9  ;;  %p960_p13 = por %p959_p12, %p958_p11 }
  0x16   : > { %p961_p1 = pnand %p960_p13, %p956_p10 }
  0x18   : > { %964 = shalt.err (!%p961_p1)
}
  0x19   : > { %s965_s14 = scalar_lea.vmem %s1188_s5, 4096  ;;  %s1104_s20 = smov [#allocation5]  }
  0x1a   : > { %p966_p2 = scmp.ne.s32.totalorder %s1188_s5, %s965_s14  ;;  %s970_s21 = sshll.u32 %s1104_s20, 4  ;;  %s971_s21 = int_to_ptr.vmem [resolvable:$false] %s970_s21 }
  0x1b   : > { %s972_s23 = scalar_lea.vmem %s971_s21, 8192  ;;  %p973_p7 = scmp.lt.s32.totalorder %s1188_s5, %s971_s21 }
  0x1c   : > { %p968_p4 = pnand %p966_p2, %p1413_p8  ;;  %p974_p9 = scmp.lt.s32.totalorder %s972_s23, %s965_s14 }
  0x1e   : > { %p969_p5 = pneg %p968_p4  ;;  %p975_p3 = por %p974_p9, %p973_p7 }
  0x20   : > { %p976_p11 = pnand %p975_p3, %p969_p5 }
  0x22   : > { %979 = shalt.err (!%p976_p11)
}
  0x23   : > { %s1105_s25 = smov 256   ;;  %s1106_s26 = smov 128  }
  0x24   : > { %s1107_s27 = smov 8   ;;  %s1223_s28 = sadd.s32 4294967295, %s1102_s18  }
  0x25   : > { %847 = dma.hbm_to_vmem [thread:$0]  (!%p1190_p6), %s1186_s29, 4096, %s1188_s5, %s1194_s7, %s1105_s25, %s1106_s26, %s1107_s27  }
  0x26   : > { %s770_s30 = sadd.s32 4294967294, %s1102_s18   ;;  %p62_p3 = scmp.ne.s32.totalorder %s1094_s16, %s1090_s15 }
  0x27   : > { %p1412_p10 = scmp.eq.s32.totalorder %s1223_s28, 0  ;;  %p138_p12 = scmp.eq.s32.totalorder %s1223_s28, 1 }
  0x28   : > { %p144_p13 = scmp.eq.s32.totalorder %s770_s30, 1  ;;  %p771_p1 = scmp.ge.s32.totalorder %s1102_s18, 1 }
  0x29   : > { %p1233_p2 = por %p1412_p10, %p62_p3  ;;  %p1240_p4 = por %p138_p12, %p56_p0 }
  0x2a   : > { %p1244_p5 = por %p144_p13, %p62_p3  ;;  %p151_p7 = scmp.lt.s32.totalorder %s1102_s18, 3 }
  0x2b   : > { %s1417_s8 = scalar_select %p1233_p2, 1, 0 }
  0x2c   : > { %s1418_s29 = scalar_select %p1240_p4, 1, 0 }
  0x2d   : > { %s1419_s5 = scalar_select %p1244_p5, 1, 0 }
  0x2e   : > { %p1249_p9 = pnand %p771_p1, %p151_p7  ;;  %s1108_s10 = smov [#allocation2]  }
  0x2f   : > { %s163_s11 = sshll.u32 %s1108_s10, 4  ;;  %s777_s12 = sshll.u32 %s179_s24, 1  ;;  %s164_s11 = int_to_ptr.vmem [resolvable:$true] %s163_s11 }
  0x30   : > { %p840_p11 = pneg %p1249_p9  ;;  %s826_s13 = sshll.u32 %s1102_s18, 5 }
  0x31   : > { %s1267_s23 = scalar_lea.hbm %s1409_s2, %s826_s13  ;;  %s202_s26 = scalar_lea.vmem [#allocation7], %s777_s12 }
  0x32   : > { %p1260_p0 = pnand %p840_p11, %p1412_p10  ;;  %s210_s27 = sshll.u32 %s202_s26, 4  ;;  %s1269_s27 = int_to_ptr.vmem [resolvable:$true] %s210_s27 }
  0x33   : > { %s991_s30 = scalar_lea.vmem %s164_s11, 512  ;;  %p999_p7 = scmp.lt.s32.totalorder %s164_s11, %s164_s11 }
  0x34   : > { %p982_p3 = pneg %p1260_p0  ;;  %p992_p12 = scmp.ne.s32.totalorder %s164_s11, %s991_s30 }
  0x35   : > { %p1000_p11 = scmp.lt.s32.totalorder %s991_s30, %s991_s30 }
  0x36   : > { %p994_p13 = pnand %p992_p12, %p982_p3 }
  0x37   : > { %p1001_p10 = por %p1000_p11, %p999_p7 }
  0x38   : > { %p995_p1 = pneg %p994_p13 }
  0x3a   : > { %p1002_p8 = pnand %p1001_p10, %p995_p1 }
  0x3c   : > { %1005 = shalt.err (!%p1002_p8)
}
  0x3d   : > { %s1109_s24 = smov 16   ;;  %s1006_s13 = scalar_lea.hbm %s1267_s23, 32 }
  0x3e   : > { %843 = dma.hbm_to_vmem [thread:$0]  (!%p1260_p0), %s1407_s0, 512, %s164_s11, [#allocation3], %s1105_s25, %s1105_s25, %s1109_s24  }
  0x3f   : > { %p1007_p3 = scmp.ne.s32.totalorder %s1267_s23, %s1006_s13  ;;  %p1422_p12 = pneg %p1190_p6 }
  0x40   : > { %s1011_s14 = scalar_lea.hbm %s1409_s2, 64  ;;  %p1012_p8 = scmp.lt.s32.totalorder %s1267_s23, %s1409_s2 }
  0x41   : > { %p1009_p13 = pnand %p1007_p3, %p1422_p12  ;;  %p1013_p1 = scmp.lt.s32.totalorder %s1011_s14, %s1006_s13 }
  0x43   : > { %p1010_p10 = pneg %p1009_p13  ;;  %p1014_p7 = por %p1013_p1, %p1012_p8 }
  0x45   : > { %p1015_p11 = pnand %p1014_p7, %p1010_p10 }
  0x47   : > { %1018 = shalt.err (!%p1015_p11)
}
  0x48   : > { %s1019_s25 = scalar_lea.vmem %s1269_s27, 32  ;;  %p1423_p3 = pmov %p1422_p12 }
  0x49   : > { %p1020_p0 = scmp.ne.s32.totalorder %s1269_s27, %s1019_s25  ;;  %s1110_s11 = smov [#allocation7]  }
  0x4a   : > { %s1024_s24 = sshll.u32 %s1110_s11, 4  ;;  %s1025_s24 = int_to_ptr.vmem [resolvable:$false] %s1024_s24 }
  0x4b   : > { %p1022_p12 = pnand %p1020_p0, %p1423_p3  ;;  %s1026_s10 = scalar_lea.vmem %s1025_s24, 64 }
  0x4c   : > { %p1027_p5 = scmp.lt.s32.totalorder %s1269_s27, %s1025_s24  ;;  %p1028_p4 = scmp.lt.s32.totalorder %s1026_s10, %s1019_s25 }
  0x4d   : > { %p1023_p13 = pneg %p1022_p12 }
  0x4e   : > { %p1029_p2 = por %p1028_p4, %p1027_p5 }
  0x50   : > { %p1030_p8 = pnand %p1029_p2, %p1023_p13 }
  0x52   : > { %1033 = shalt.err (!%p1030_p8)
}
  0x53   : > { %850 = dma.hbm_to_vmem [thread:$0]  (!%p1190_p6), %s1267_s23, 32, %s1269_s27, %s1194_s7  }
  0x54   : > { %227 = sbr.rel (%p1249_p9) target bundleno = 444 (0x1bc), region = 36  ;;  %p1424_p10 = scmp.eq.s32.totalorder (!%p1249_p9), %s1223_s28, 0 }
  0x59   : > { %1077 = dma.done.wait (%p1424_p10), [#allocation3], 512   ;;  %p1425_p1 = pmov %p1424_p10 }
  0x5a   : > { %s233_s12 = sand.u32 1, %s1223_s28   ;;  %s1311_s13 = sand.u32 1, %s1094_s16  }
  0x5b   : > { %1079 = vsyncadd (%p1425_p1), [#allocation3], 4294966784  ;;  %s782_s6 = sshll.u32 %s1311_s13, 8  ;;  %s234_s20 = scalar_lea.sflag [#allocation6], %s233_s12 }
  0x5c   : > { %s1314_s21 = scalar_lea.vmem [#allocation5], %s782_s6  ;;  %p1426_p6 = scmp.ne.s32.totalorder %s1417_s8, 0 }
  0x5e   : > { %1081 = dma.done.wait (%p1426_p6), %s234_s20, 4128  }
  0x5f   : > { %1083 = vsyncadd (%p1426_p6), %s234_s20, 4294963168  ;;  %v900_v0 = vld [vmem:[%s1314_s21 + $0x74] ss:$8 sps:$4 sm:$0xff]   ;;  %v902_v1 = vld [vmem:[%s1314_s21 + $0x70] ss:$8 sps:$4 sm:$0xff]   ;;  %s785_s7 = sshll.u32 %s1223_s28, 1 }
  0x60   : > { %486 = vmatprep.subr.bf16.mxu0 %v900_v0  ;;  %v903_v2 = vld [vmem:[%s1314_s21 + $0x64] ss:$8 sps:$4 sm:$0xff]   ;;  %v905_v3 = vld [vmem:[%s1314_s21 + $0x60] ss:$8 sps:$4 sm:$0xff]   ;;  %v906_v4 = vld [vmem:[%s1314_s21 + $0x54] ss:$8 sps:$4 sm:$0xff]  }
  0x61   : > { %487 = vmatpush1.bf16.msra.mxu0 %v902_v1  ;;  %v908_v5 = vld [vmem:[%s1314_s21 + $0x50] ss:$8 sps:$4 sm:$0xff]   ;;  %v909_v6 = vld [vmem:[%s1314_s21 + $0x44] ss:$8 sps:$4 sm:$0xff]   ;;  %v911_v7 = vld [vmem:[%s1314_s21 + $0x40] ss:$8 sps:$4 sm:$0xff]  }
  0x62   : > { %488 = vmatprep.subr.bf16.mxu0 %v903_v2  ;;  %v912_v8 = vld [vmem:[%s1314_s21 + $0x34] ss:$8 sps:$4 sm:$0xff]   ;;  %v914_v9 = vld [vmem:[%s1314_s21 + $0x30] ss:$8 sps:$4 sm:$0xff]   ;;  %v915_v10 = vld [vmem:[%s1314_s21 + $0x24] ss:$8 sps:$4 sm:$0xff]  }
  0x63   : > { %v917_v11 = vld [vmem:[%s1314_s21 + $0x20] ss:$8 sps:$4 sm:$0xff]   ;;  %v918_v12 = vld [vmem:[%s1314_s21 + $0x14] ss:$8 sps:$4 sm:$0xff]   ;;  %v920_v16 = vld [vmem:[%s1314_s21 + $0x10] ss:$8 sps:$4 sm:$0xff]  }
  0x64   : > { %v289_v13 = vld [vmem:[#allocation2 + $0x8] sm:$0xff]  ;;  %v291_v14 = vld [vmem:[#allocation2 + $0x18] sm:$0xff]  ;;  %v288_v35 = vld [vmem:[#allocation2] sm:$0xff]  ;;  %p283_p2 = scmp.lt.s32.totalorder %s785_s7, 3  ;;  %s783_s8 = sshll.u32 %s1311_s13, 1 }
  0x65   : > { %489 = vmatpush1.bf16.msra.mxu0 %v905_v3  ;;  %v293_v15 = vpack.c.bf16 %v291_v14, %v289_v13  ;;  %v921_v17 = vld [vmem:[%s1314_s21 + $0x4] ss:$8 sps:$4 sm:$0xff]   ;;  %v923_v18 = vld [vmem:[%s1314_s21] ss:$8 sps:$4 sm:$0xff]   ;;  %v924_v19 = vld [vmem:[%s1314_s21 + $0xf4] ss:$8 sps:$4 sm:$0xff]  }
  0x66   : > { %490 = vmatprep.subr.bf16.mxu0 %v906_v4  ;;  %v926_v20 = vld [vmem:[%s1314_s21 + $0xf0] ss:$8 sps:$4 sm:$0xff]   ;;  %v927_v21 = vld [vmem:[%s1314_s21 + $0xe4] ss:$8 sps:$4 sm:$0xff]   ;;  %v929_v22 = vld [vmem:[%s1314_s21 + $0xe0] ss:$8 sps:$4 sm:$0xff]  }
  0x67   : > { %518 = vmatprep.mubr.bf16.mxu0 %v293_v15  ;;  %v930_v23 = vld [vmem:[%s1314_s21 + $0xd4] ss:$8 sps:$4 sm:$0xff]   ;;  %v932_v24 = vld [vmem:[%s1314_s21 + $0xd0] ss:$8 sps:$4 sm:$0xff]   ;;  %v933_v25 = vld [vmem:[%s1314_s21 + $0xc4] ss:$8 sps:$4 sm:$0xff]  }
  0x68   : > { %v935_v26 = vld [vmem:[%s1314_s21 + $0xc0] ss:$8 sps:$4 sm:$0xff]   ;;  %v936_v27 = vld [vmem:[%s1314_s21 + $0xb4] ss:$8 sps:$4 sm:$0xff]   ;;  %v938_v28 = vld [vmem:[%s1314_s21 + $0xb0] ss:$8 sps:$4 sm:$0xff]  }
  0x69   : > { %491 = vmatpush1.bf16.msra.mxu0 %v908_v5  ;;  %v939_v29 = vld [vmem:[%s1314_s21 + $0xa4] ss:$8 sps:$4 sm:$0xff]   ;;  %v941_v30 = vld [vmem:[%s1314_s21 + $0xa0] ss:$8 sps:$4 sm:$0xff]   ;;  %v942_v31 = vld [vmem:[%s1314_s21 + $0x94] ss:$8 sps:$4 sm:$0xff]  }
  0x6a   : > { %492 = vmatprep.subr.bf16.mxu0 %v909_v6  ;;  %v944_v32 = vld [vmem:[%s1314_s21 + $0x90] ss:$8 sps:$4 sm:$0xff]   ;;  %v945_v33 = vld [vmem:[%s1314_s21 + $0x84] ss:$8 sps:$4 sm:$0xff]   ;;  %v947_v34 = vld [vmem:[%s1314_s21 + $0x80] ss:$8 sps:$4 sm:$0xff]  }
  0x6b   : > { %v290_v36 = vld [vmem:[#allocation2 + $0x10] sm:$0xff]  ;;  %s1435_s7 = smov (!%p283_p2, %s785_s7), 3  ;;  %s246_s14 = scalar_lea.vmem [#allocation7], %s783_s8 }
  0x6c   : > { %v292_v37 = vpack.c.bf16 %v290_v36, %v288_v35  ;;  %s285_s27 = scalar_lea.vmem %s1410_s3, %s1435_s7  ;;  %s784_s26 = sshll.u32 %s1311_s13, 4 }
  0x6d   : > { %493 = vmatpush1.bf16.msra.mxu0 %v911_v7  ;;  %s279_s30 = scalar_lea.vmem [#allocation8], %s784_s26  ;;  %s829_s11 = sshll.u32 %s1223_s28, 7 }
  0x6e   : > { %494 = vmatprep.subr.bf16.mxu0 %v912_v8  ;;  %s656_s25 = sshll.u32 %s279_s30, 4  ;;  %s1364_s12 = scalar_lea.hbm %s1411_s4, %s829_s11  ;;  %s1359_s25 = int_to_ptr.vmem [resolvable:$true] %s656_s25 }
  0x6f   : > { %s643_s6 = scalar_lea.sflag [#allocation4], %s1311_s13  ;;  %s1034_s28 = scalar_lea.vmem %s1359_s25, 256 }
  0x70   : > { %p1035_p4 = scmp.ne.s32.totalorder %s1359_s25, %s1034_s28  ;;  %p1427_p5 = scmp.ne.s32.totalorder %s1418_s29, 0 }
  0x71   : > { %495 = vmatpush1.bf16.msra.mxu0 %v914_v9  ;;  %s1112_s20 = smov [#allocation8]  }
  0x72   : > { %496 = vmatprep.subr.bf16.mxu0 %v915_v10  ;;  %p1036_p9 = pnand %p1035_p4, %p1427_p5  ;;  %s1038_s21 = sshll.u32 %s1112_s20, 4  ;;  %s1039_s21 = int_to_ptr.vmem [resolvable:$false] %s1038_s21 }
  0x73   : > { %s1040_s7 = scalar_lea.vmem %s1039_s21, 512  ;;  %p1041_p11 = scmp.lt.s32.totalorder %s1359_s25, %s1039_s21 }
  0x74   : > { %p1037_p7 = pneg %p1036_p9  ;;  %p1042_p0 = scmp.lt.s32.totalorder %s1040_s7, %s1034_s28 }
  0x75   : > { %497 = vmatpush1.bf16.msra.mxu0 %v917_v11 }
  0x76   : > { %498 = vmatprep.subr.bf16.mxu0 %v918_v12  ;;  %p1043_p3 = por %p1042_p0, %p1041_p11 }
  0x78   : > { %p1044_p12 = pnand %p1043_p3, %p1037_p7 }
  0x79   : > { %499 = vmatpush1.bf16.msra.mxu0 %v920_v16 }
  0x7a   : > { %500 = vmatprep.subr.bf16.mxu0 %v921_v17 }
  0x7d   : > { %501 = vmatpush1.bf16.msra.mxu0 %v923_v18 }
  0x7e   : > { %502 = vmatprep.subr.bf16.mxu0 %v924_v19 }
  0x81   : > { %503 = vmatpush2.bf16.msra.mxu0 %v926_v20  ;;  %v1111_v20 = vmov 1966171168  }
  0x82   : > { %504 = vmatprep.subr.bf16.mxu0 %v927_v21  ;;  %v578_v21 = vunpack.c.l.s4 %v1111_v20 }
  0x85   : > { %505 = vmatpush2.bf16.msra.mxu0 %v929_v22  ;;  %v580_v22 = vlaneseq }
  0x86   : > { %506 = vmatprep.subr.bf16.mxu0 %v930_v23  ;;  %v579_v23 = vunpack.c.0.s8 %v578_v21 }
  0x89   : > { %507 = vmatpush2.bf16.msra.mxu0 %v932_v24  ;;  %v581_v24 = vshrl.u32 %v580_v22, 7 }
  0x8a   : > { %508 = vmatprep.subr.bf16.mxu0 %v933_v25 }
  0x8d   : > { %509 = vmatpush2.bf16.msra.mxu0 %v935_v26  ;;  %v582_v26 = vsub.s32 %v579_v23, %v581_v24 }
  0x8e   : > { %510 = vmatprep.subr.bf16.mxu0 %v936_v27 }
  0x91   : > { %511 = vmatpush2.bf16.msra.mxu0 %v938_v28 }
  0x92   : > { %512 = vmatprep.subr.bf16.mxu0 %v939_v29 }
  0x95   : > { %513 = vmatpush2.bf16.msra.mxu0 %v941_v30  ;;  %v569_v30 = vld [vmem:[%s246_s14] sm:$0x3] }
  0x96   : > { %514 = vmatprep.subr.bf16.mxu0 %v942_v31 }
  0x99   : > { %515 = vmatpush2.bf16.msra.mxu0 %v944_v32  ;;  %v596_v32 = vsub.s32 0, %v581_v24 }
  0x9a   : > { %516 = vmatprep.subr.bf16.mxu0 %v945_v33  ;;  %v600_v33 = vsub.s32 1, %v581_v24 }
  0x9d   : > { %517 = vmatpush2.bf16.msra.mxu0 %v947_v34  ;;  %v608_v34 = vld [vmem:[%s285_s27] sm:$0x3] }
  0xa0   : > { %519 = vmatmul.mubr.bf16.vlgmr.msra.gmra.mxu0 %v292_v37 }
 0x160   : > { %v520_v38 = vpop.f32.mrf.mxu0 }
 0x162   : > { %v522_v39 = vpop.f32.mrf.mxu0 }
 0x164   : > { %v524_v40 = vpop.f32.mrf.mxu0 }
 0x165   : > { %v529_v41 = vadd.f32 %v524_v40, %v520_v38 }
 0x166   : > { %v526_v42 = vpop.f32.mrf.mxu0 }
 0x167   : > { %v530_v43 = vrot.slane %v529_v41, 4  ;;  %v536_v44 = vadd.f32 %v526_v42, %v522_v39 }
 0x169   : > { %v531_v45 = vadd.f32 %v530_v43, %v529_v41  ;;  %v537_v46 = vrot.slane %v536_v44, 4 }
 0x16b   : > { %v532_v47 = vrot.slane %v531_v45, 2  ;;  %v538_v48 = vadd.f32 %v537_v46, %v536_v44 }
 0x16d   : > { %v533_v49 = vadd.f32 %v532_v47, %v531_v45  ;;  %v539_v50 = vrot.slane %v538_v48, 2 }
 0x16f   : > { %v534_v51 = vrot.slane %v533_v49, 1  ;;  %v540_v52 = vadd.f32 %v539_v50, %v538_v48 }
 0x171   : > { %v535_v53 = vadd.f32 %v534_v51, %v533_v49  ;;  %v541_v54 = vrot.slane %v540_v52, 1 }
 0x173   : > { %v543_v55 = vmul.f32 0.0625, %v535_v53  ;;  %v542_v56 = vadd.f32 %v541_v54, %v540_v52 }
 0x175   : > { %v545_v57 = vsub.f32 %v520_v38, %v543_v55  ;;  %v547_v58 = vsub.f32 %v524_v40, %v543_v55  ;;  %v544_v59 = vmul.f32 0.0625, %v542_v56  ;;  %v613_v38 = vrot.slane %v608_v34, %v596_v32 }
 0x177   : > { %v549_v60 = vmul.f32 %v545_v57, %v545_v57  ;;  %v551_v61 = vmul.f32 %v547_v58, %v547_v58  ;;  %v546_v62 = vsub.f32 %v522_v39, %v544_v59  ;;  %v548_v63 = vsub.f32 %v526_v42, %v544_v59 }
 0x178   : > { %v617_v39 = vrot.slane %v608_v34, %v600_v33 }
 0x179   : > { %v553_v0 = vadd.f32 %v551_v61, %v549_v60  ;;  %v550_v1 = vmul.f32 %v546_v62, %v546_v62  ;;  %v552_v2 = vmul.f32 %v548_v63, %v548_v63 }
 0x17b   : > { %v554_v3 = vrot.slane %v553_v0, 4  ;;  %v560_v4 = vadd.f32 %v552_v2, %v550_v1 }
 0x17d   : > { %v555_v5 = vadd.f32 %v554_v3, %v553_v0  ;;  %v561_v6 = vrot.slane %v560_v4, 4 }
 0x17f   : > { %v556_v7 = vrot.slane %v555_v5, 2  ;;  %v562_v8 = vadd.f32 %v561_v6, %v560_v4 }
 0x181   : > { %v557_v9 = vadd.f32 %v556_v7, %v555_v5  ;;  %v563_v10 = vrot.slane %v562_v8, 2 }
 0x183   : > { %v558_v11 = vrot.slane %v557_v9, 1  ;;  %v564_v12 = vadd.f32 %v563_v10, %v562_v8 }
 0x185   : > { %v559_v13 = vadd.f32 %v558_v11, %v557_v9  ;;  %v565_v14 = vrot.slane %v564_v12, 1 }
 0x187   : > { %v567_v15 = vmul.f32 0.0625, %v559_v13  ;;  %v566_v16 = vadd.f32 %v565_v14, %v564_v12 }
 0x189   : > { %v570_v17 = vadd.f32 1e-05, %v567_v15  ;;  %v568_v18 = vmul.f32 0.0625, %v566_v16 }
 0x18b   : > { %v571_v19 = vadd.f32 1e-05, %v568_v18  ;;  %948 = vrsqrt.f32 %v570_v17 }
 0x18d   : > { %950 = vrsqrt.f32 %v571_v19 }
 0x198   : > { %v949_v25 = vpop.eup %948 }
 0x19a   : > { %v951_v27 = vpop.eup %950 }
 0x19b   : > { %v576_v28 = vcombine.low %v949_v25, %v951_v27 }
 0x19d   : > { %v583_v29 = vrot.slane %v576_v28, %v582_v26 }
 0x19f   : > { %v590_v31 = vrot.slane %v583_v29, %v582_v26 }
 0x1a1   : > { %v592_v35 = vmul.f32 %v590_v31, %v569_v30 }
 0x1a3   : > { %v597_v36 = vrot.slane %v592_v35, %v596_v32  ;;  %v601_v37 = vrot.slane %v592_v35, %v600_v33 }
 0x1a5   : > { %v604_v40 = vmul.f32 %v597_v36, %v545_v57  ;;  %v605_v41 = vmul.f32 %v601_v37, %v546_v62  ;;  %v606_v42 = vmul.f32 %v597_v36, %v547_v58  ;;  %v607_v43 = vmul.f32 %v601_v37, %v548_v63 }
 0x1a7   : > { %v620_v44 = vadd.f32 %v613_v38, %v604_v40  ;;  %v621_v45 = vadd.f32 %v617_v39, %v605_v41  ;;  %v622_v46 = vadd.f32 %v613_v38, %v606_v42  ;;  %v623_v47 = vadd.f32 %v617_v39, %v607_v43 }
 0x1a9   : > { %v624_v48 = vmax.f32 %v620_v44, 0.0  ;;  %v625_v49 = vmax.f32 %v621_v45, 0.0  ;;  %v626_v50 = vmax.f32 %v622_v46, 0.0  ;;  %v627_v51 = vmax.f32 %v623_v47, 0.0 }
 0x1ab   : > { %v827_v52 = vpack.c.bf16 %v625_v49, %v624_v48  ;;  %v828_v53 = vpack.c.bf16 %v627_v51, %v626_v50 }
 0x1ad   : > { %640 = vst [vmem:[%s279_s30] sm:$0xff] %v827_v52  ;;  %641 = vst [vmem:[%s279_s30 + $0x8] sm:$0xff] %v828_v53 }
 0x1ae   : > { %1047 = shalt.err (!%p1044_p12)
}
 0x1af   : > { %s1048_s8 = scalar_lea.hbm %s1364_s12, 256  ;;  %s1052_s27 = scalar_lea.hbm %s1411_s4, 512 }
 0x1b0   : > { %p1049_p13 = scmp.ne.s32.totalorder %s1364_s12, %s1048_s8  ;;  %p1053_p1 = scmp.lt.s32.totalorder %s1364_s12, %s1411_s4 }
 0x1b1   : > { %p1054_p6 = scmp.lt.s32.totalorder %s1052_s27, %s1048_s8 }
 0x1b2   : > { %p1050_p8 = pnand %p1049_p13, %p1427_p5 }
 0x1b3   : > { %p1055_p2 = por %p1054_p6, %p1053_p1 }
 0x1b4   : > { %p1051_p10 = pneg %p1050_p8 }
 0x1b6   : > { %p1056_p4 = pnand %p1055_p2, %p1051_p10 }
 0x1b8   : > { %1059 = shalt.err (!%p1056_p4)
}
 0x1b9   : > { %s1113_s30 = smov 128   ;;  %s1114_s11 = smov 256  }
 0x1ba   : > { %s1115_s24 = smov 8  }
 0x1bb   : > { %838 = dma.vmem_to_hbm [thread:$0]  (%p1427_p5), %s1359_s25, 256, %s1364_s12, %s643_s6, %s1113_s30, %s1114_s11, %s1115_s24  }
 0x1bc PF: > { %s671_s10 = sand.u32 1, %s1090_s15   ;;  %p1428_p9 = scmp.ne.s32.totalorder %s1419_s5, 0 }
 0x1bd   : > { %p1429_p7 = scmp.ge.s32.totalorder %s1102_s18, 2  ;;  %s672_s28 = scalar_lea.sflag [#allocation4], %s671_s10 }
 0x1bf   : > { %p852_p11 = pnand %p1429_p7, %p1428_p9 }
 0x1c1   : > { %p853_p0 = pneg %p852_p11 }
 0x1c3   : > { %1085 = dma.done.wait (%p853_p0), %s672_s28, 256  }
 0x1c4   : > { %1087 = vsyncadd (%p853_p0), %s672_s28, 4294967040  ;;  %p18_p3 = scmp.ge.s32.totalorder %s1162_s19, 4   ;;  %s1430_s15 = smov %s1094_s16 }
 0x1c5   : > { %s1431_s16 = smov %s1098_s17  ;;  %s1432_s17 = smov %s1172_s22 }
 0x1c6   : > { %s1433_s18 = smov %s1162_s19  ;;  %20 = sbr.rel (!%p18_p3) target bundleno = 6 (0x6), region = 100 }
 0x1cb   :  { %677 = vsyncpa [#allocation3], 1 }
 0x1cc   :  { %679 = vsyncpa [#allocation3 + $0x1], 1 }
 0x1cd   :  { %680 = vsyncpa [#allocation6], 1 }
 0x1ce   :  { %682 = vsyncpa [#allocation6 + $0x1], 1 }
 0x1cf   :  { %683 = vsyncpa [#allocation4], 1 }
 0x1d0   :  { %685 = vsyncpa [#allocation4 + $0x1], 1 }

</bundles_post_ra>
